<compile_context>
chip_gen: v6e
topology: v6e:2x2x1
jax: 0.10.0
libtpu: 0.0.40
codegen_flags: <defaults>
</compile_context>

<pallas_src>
import functools

import numpy as np
import jax
import jax.numpy as jnp
from jax import lax
from jax.experimental import pallas as pl
from jax.experimental.pallas import tpu as pltpu


# --------------------------------------------------------------------------- #
# Kernel 1: build the renormalized, pre-scaled block mask (one shot).         #
# --------------------------------------------------------------------------- #
def _mask_build_kernel(gamma_ref, u_ref, mask_ref, *, block_size, W):
    """threshold -> separable zero-padded max-pool -> fold renorm scale in."""
    B, HW = u_ref.shape
    pad = block_size // 2
    offs = [d for d in range(-pad, block_size - pad) if d != 0]

    gamma = gamma_ref[0, 0]                        # runtime scalar (no recompile)
    u = u_ref[...]                                 # (B, HW) uniforms in [0, 1)
    seed = jnp.where(u < gamma, jnp.float32(1.0), jnp.float32(0.0))

    flat = lax.broadcasted_iota(jnp.int32, (B, HW), 1)
    col = flat % W

    # Separable max-pool with zero padding on the flattened H*W axis:
    # horizontal (W) pass then vertical (H) pass -> O(2k) instead of O(k^2).
    pooled_w = seed
    for dj in offs:
        shifted = jnp.roll(seed, -dj, axis=1)      # shifted[i] = seed[i + dj]
        cj = col + dj
        valid = jnp.logical_and(cj >= 0, cj < W)   # zero fill at row edges
        pooled_w = jnp.maximum(pooled_w, jnp.where(valid, shifted, 0.0))

    pooled = pooled_w
    for di in offs:
        shifted = jnp.roll(pooled_w, -di * W, axis=1)
        fi = flat + di * W
        valid = jnp.logical_and(fi >= 0, fi < HW)  # zero fill top/bottom
        pooled = jnp.maximum(pooled, jnp.where(valid, shifted, 0.0))

    block_mask = 1.0 - pooled                      # (B, HW); 0 inside dropped blocks
    total = jnp.sum(block_mask)
    # Guard the all-dropped case (the torch reference would emit inf/NaN here).
    scale = jnp.float32(B * HW) / jnp.maximum(total, jnp.float32(1.0))
    mask_ref[...] = (block_mask * scale).astype(mask_ref.dtype)


# --------------------------------------------------------------------------- #
# Kernel 2: stream x over C and apply the resident, pre-scaled mask.          #
# --------------------------------------------------------------------------- #
def _apply_mask_kernel(mask_ref, x_ref, o_ref):
    m = mask_ref[...]                              # (B, HW), x.dtype, scale folded in
    x = x_ref[...]                                 # (B, tile_c, HW)
    o_ref[...] = (x * m[:, None, :]).astype(o_ref.dtype)


# --------------------------------------------------------------------------- #
# Tiling / VMEM planning                                                      #
# --------------------------------------------------------------------------- #
def _vmem_plan():
    """(per-tile budget bytes, vmem_limit_bytes), generation-aware."""
    try:
        cap = pltpu.get_tpu_info().vmem_capacity_bytes
    except Exception:
        cap = 64 * 1024 * 1024
    if cap >= 100 * 1024 * 1024:
        # v5e / v6e: 128 MiB physical VMEM -> big tiles, 4 x 10 MiB + mask < 64 MiB.
        return 10 * 1024 * 1024, 64 * 1024 * 1024
    # v7x: 64 MiB per TC -> tighter cap, leave headroom for the resident mask.
    return 6 * 1024 * 1024, 48 * 1024 * 1024


def _pick_tile_c(B, C, HW, itemsize, tile_budget_bytes):
    """Largest C tile under the budget (x + out tiles are both double-buffered),
    rounded to the native packed sublane granularity for the dtype."""
    if itemsize >= 4:
        mult = 8
    elif itemsize == 2:
        mult = 16
    else:
        mult = 32
    budget_elems = max(1, tile_budget_bytes // max(1, itemsize))
    max_c = max(1, budget_elems // max(1, B * HW))
    if C <= max_c:
        return C                                    # full dim -> exempt from (8,128)
    tile = max((max_c // mult) * mult, mult)
    return min(tile, C)


# --------------------------------------------------------------------------- #
# Forward (jitted once per shape/dtype/block_size; drop_prob is a runtime arg) #
# --------------------------------------------------------------------------- #
@functools.partial(jax.jit, static_argnames=("block_size",))
def _dropblock_forward(x, u, gamma, *, block_size):
    B, C, H, W = x.shape
    HW = H * W
    itemsize = x.dtype.itemsize
    x3 = x.reshape(B, C, HW)                        # free reshape, lane-dense last dim

    tile_budget, vmem_limit = _vmem_plan()

    # 1) scaled block mask, built once, already in x.dtype (no per-step cast).
    mask = pl.pallas_call(
        functools.partial(_mask_build_kernel, block_size=block_size, W=W),
        out_shape=jax.ShapeDtypeStruct((B, HW), x.dtype),
        in_specs=[
            pl.BlockSpec(memory_space=pltpu.MemorySpace.SMEM),   # gamma (1,1)
            pl.BlockSpec(memory_space=pltpu.MemorySpace.VMEM),   # uniforms (B, HW)
        ],
        out_specs=pl.BlockSpec(memory_space=pltpu.MemorySpace.VMEM),
        compiler_params=pltpu.CompilerParams(vmem_limit_bytes=vmem_limit),
    )(gamma, u)

    # 2) HBM-bandwidth-bound broadcast multiply, C tiled with cdiv (padded last block).
    tile_c = _pick_tile_c(B, C, HW, itemsize, tile_budget)
    num_tiles = pl.cdiv(C, tile_c)

    cost = pl.CostEstimate(
        flops=int(x3.size),
        transcendentals=0,
        bytes_accessed=int(2 * x3.size * itemsize + B * HW * itemsize),
    )

    grid_spec = pltpu.PrefetchScalarGridSpec(
        num_scalar_prefetch=0,
        grid=(num_tiles,),
        in_specs=[
            pl.BlockSpec((B, HW), lambda c: (0, 0)),             # resident mask
            pl.BlockSpec((B, tile_c, HW), lambda c: (0, c, 0)),  # x tile
        ],
        out_specs=pl.BlockSpec((B, tile_c, HW), lambda c: (0, c, 0)),
    )

    out3 = pl.pallas_call(
        _apply_mask_kernel,
        out_shape=jax.ShapeDtypeStruct((B, C, HW), x.dtype),
        grid_spec=grid_spec,
        compiler_params=pltpu.CompilerParams(
            dimension_semantics=("parallel",),      # no cross-step scratch -> 2 TCs on v7x
            vmem_limit_bytes=vmem_limit,
        ),
        cost_estimate=cost,
    )(mask, x3)
    return out3.reshape(B, C, H, W)


# --------------------------------------------------------------------------- #
# Module wrappers (mirror the PyTorch modules; no learnable parameters)       #
# --------------------------------------------------------------------------- #
class DropBlock2D:
    """JAX/Pallas counterpart of the wrapped dropblock module."""

    def __init__(self, drop_prob, block_size):
        self.drop_prob = float(drop_prob)
        self.block_size = int(block_size)
        self.training = True

    def __call__(self, x, key):
        if (not self.training) or self.drop_prob <= 0.0:
            return x                                 # identity: skip kernels entirely
        B, C, H, W = x.shape
        u = jax.random.uniform(key, (B, H * W), dtype=jnp.float32)
        gamma = jnp.full(
            (1, 1), self.drop_prob / (self.block_size ** 2), dtype=jnp.float32
        )
        return _dropblock_forward(x, u, gamma, block_size=self.block_size)


class LinearScheduler:
    """Mirrors models/SHNet.py::LinearScheduler (forward == dropblock(x))."""

    def __init__(self, dropblock, start_value, stop_value, nr_steps):
        self.dropblock = dropblock
        self.i = 0
        self.drop_values = np.linspace(start=start_value, stop=stop_value,
                                       num=int(nr_steps))

    def forward(self, x, key):
        return self.dropblock(x, key)

    __call__ = forward

    def step(self):
        if self.i < len(self.drop_values):
            self.dropblock.drop_prob = float(self.drop_values[self.i])
        self.i += 1


# --------------------------------------------------------------------------- #
# Pure-JAX reference (for the self-check below)                               #
# --------------------------------------------------------------------------- #
def _reference_dropblock(x, u, drop_prob, block_size):
    B, C, H, W = x.shape
    gamma = drop_prob / (block_size ** 2)
    seed = (u.reshape(B, H, W) < gamma).astype(jnp.float32)
    pad = block_size // 2
    pooled = lax.reduce_window(
        seed, 0.0, lax.max,
        window_dimensions=(1, block_size, block_size),
        window_strides=(1, 1, 1),
        padding=((0, 0), (pad, pad), (pad, pad)),
    )
    if block_size % 2 == 0:
        pooled = pooled[:, :H, :W]
    block_mask = 1.0 - pooled
    out = x * block_mask[:, None, :, :]
    return out * (block_mask.size / jnp.sum(block_mask))


if __name__ == "__main__":
    root = jax.random.PRNGKey(0)
    kx, k0, k1 = jax.random.split(root, 3)
    x = jax.random.normal(kx, (2, 4, 16, 16), dtype=jnp.float32)   # NCHW

    dropblock = DropBlock2D(drop_prob=0.0, block_size=3)
    scheduler = LinearScheduler(dropblock, start_value=0.0, stop_value=0.25,
                                nr_steps=5)

    # Schedule step 0: drop_prob == 0 -> identity fast path (no kernel launch).
    y0 = scheduler(x, k0)
    jax.block_until_ready(y0)
    assert y0.shape == x.shape
    assert bool(jnp.allclose(y0, x))

    # Advance the linear schedule so drop_prob > 0 and both Pallas kernels run
    # (mask build + C-tiled masked multiply).
    for _ in range(3):
        scheduler.step()
    assert dropblock.drop_prob > 0.0
    y1 = scheduler(x, k1)
    jax.block_until_ready(y1)
    assert y1.shape == x.shape
    assert bool(jnp.all(jnp.isfinite(y1)))

    # Cross-check against a plain-JAX reference using the same uniforms.
    u_chk = jax.random.uniform(k1, (x.shape[0], x.shape[2] * x.shape[3]),
                               dtype=jnp.float32)
    y_ref = _reference_dropblock(x, u_chk, dropblock.drop_prob,
                                 dropblock.block_size)
    assert bool(jnp.allclose(y1, y_ref, rtol=1e-5, atol=1e-5))

    # Changing drop_prob again reuses the same compiled program (gamma is a
    # runtime operand, not a baked-in constant).
    scheduler.step()
    y2 = scheduler(x, k1)
    jax.block_until_ready(y2)
    assert y2.shape == x.shape

    print("KERNEL_OK")
</pallas_src>

<mosaic_0001>
module attributes {stable_mosaic.version = 11 : i64} {
  func.func @_apply_mask_kernel(%arg0: i32, %arg1: memref<2x256xf32, #tpu.memory_space<vmem>>, %arg2: memref<2x4x256xf32, #tpu.memory_space<vmem>>, %arg3: memref<2x4x256xf32, #tpu.memory_space<vmem>>) attributes {dimension_semantics = [#tpu.dimension_semantics<parallel>], iteration_bounds = array<i64: 1>, scalar_prefetch = 0 : i64, scratch_operands = 0 : i64, tpu.core_type = #tpu.core_type<tc>, window_params = [{pipeline_mode = #tpu.pipeline_mode<synchronous>, transform_indices = @transform_0, window_bounds = array<i64: 2, 256>}, {transform_indices = @transform_1, window_bounds = array<i64: 2, 4, 256>}, {transform_indices = @transform_2, window_bounds = array<i64: 2, 4, 256>}]} {
    %c0 = arith.constant 0 : index
    %c0_0 = arith.constant 0 : index
    %0 = vector.load %arg1[%c0, %c0_0] : memref<2x256xf32, #tpu.memory_space<vmem>>, vector<2x256xf32>
    %c0_1 = arith.constant 0 : index
    %c0_2 = arith.constant 0 : index
    %c0_3 = arith.constant 0 : index
    %1 = vector.load %arg2[%c0_1, %c0_2, %c0_3] : memref<2x4x256xf32, #tpu.memory_space<vmem>>, vector<2x4x256xf32>
    %2 = vector.shape_cast %0 : vector<2x256xf32> to vector<2x1x256xf32>
    %3 = vector.broadcast %2 : vector<2x1x256xf32> to vector<2x4x256xf32>
    %4 = arith.mulf %1, %3 : vector<2x4x256xf32>
    %c0_4 = arith.constant 0 : index
    %c0_5 = arith.constant 0 : index
    %c0_6 = arith.constant 0 : index
    %5 = vector.load %arg3[%c0_4, %c0_5, %c0_6] : memref<2x4x256xf32, #tpu.memory_space<vmem>>, vector<2x4x256xf32>
    tpu.vector_store %arg3[%c0_4, %c0_5, %c0_6], %4 {strides = array<i32>} : memref<2x4x256xf32, #tpu.memory_space<vmem>>, vector<2x4x256xf32>,
    return
  }
  func.func @transform_0(%arg0: i32) -> (i32, i32) {
    %c0_i32 = arith.constant 0 : i32
    %c0_i32_0 = arith.constant 0 : i32
    %c0_i32_1 = arith.constant 0 : i32
    return %c0_i32, %c0_i32_0 : i32, i32
  }
  func.func @transform_1(%arg0: i32) -> (i32, i32, i32) {
    %c0_i32 = arith.constant 0 : i32
    %c0_i32_0 = arith.constant 0 : i32
    %c0_i32_1 = arith.constant 0 : i32
    return %c0_i32, %arg0, %c0_i32_0 : i32, i32, i32
  }
  func.func @transform_2(%arg0: i32) -> (i32, i32, i32) {
    %c0_i32 = arith.constant 0 : i32
    %c0_i32_0 = arith.constant 0 : i32
    %c0_i32_1 = arith.constant 0 : i32
    return %c0_i32, %arg0, %c0_i32_0 : i32, i32, i32
  }
}

module attributes {stable_mosaic.version = 11 : i64} {
  func.func @_mask_build_kernel(%arg0: memref<1x1xf32, #tpu.memory_space<smem>>, %arg1: memref<2x256xf32, #tpu.memory_space<vmem>>, %arg2: memref<2x256xf32, #tpu.memory_space<vmem>>) attributes {dimension_semantics = [], scalar_prefetch = 0 : i64, scratch_operands = 0 : i64, tpu.core_type = #tpu.core_type<tc>} {
    %c0 = arith.constant 0 : index
    %c0_0 = arith.constant 0 : index
    %0 = memref.load %arg0[%c0, %c0_0] : memref<1x1xf32, #tpu.memory_space<smem>>
    %c0_1 = arith.constant 0 : index
    %c0_2 = arith.constant 0 : index
    %1 = vector.load %arg1[%c0_1, %c0_2] : memref<2x256xf32, #tpu.memory_space<vmem>>, vector<2x256xf32>
    %2 = vector.broadcast %0 : f32 to vector<2x256xf32>
    %3 = arith.cmpf olt, %1, %2 : vector<2x256xf32>
    %cst = arith.constant 1.000000e+00 : f32
    %cst_3 = arith.constant 0.000000e+00 : f32
    %4 = vector.broadcast %cst : f32 to vector<2x256xf32>
    %5 = vector.broadcast %cst_3 : f32 to vector<2x256xf32>
    %6 = arith.select %3, %4, %5 : vector<2x256xi1>, vector<2x256xf32>
    %7 = tpu.iota {dimensions = array<i32: 1>} : vector<2x256xi32>
    %c16_i32 = arith.constant 16 : i32
    %c0_i32 = arith.constant 0 : i32
    %8 = arith.cmpi eq, %c16_i32, %c0_i32 : i32
    %c1_i32 = arith.constant 1 : i32
    %9 = arith.select %8, %c1_i32, %c16_i32 : i32
    %10 = vector.broadcast %9 : i32 to vector<2x256xi32>
    %11 = arith.remsi %7, %10 : vector<2x256xi32>
    %c0_i32_4 = arith.constant 0 : i32
    %12 = vector.broadcast %c0_i32_4 : i32 to vector<2x256xi32>
    %13 = arith.cmpi ne, %11, %12 : vector<2x256xi32>
    %c0_i32_5 = arith.constant 0 : i32
    %14 = vector.broadcast %c0_i32_5 : i32 to vector<2x256xi32>
    %15 = arith.cmpi slt, %11, %14 : vector<2x256xi32>
    %c0_i32_6 = arith.constant 0 : i32
    %16 = arith.cmpi slt, %9, %c0_i32_6 : i32
    %17 = vector.broadcast %16 : i1 to vector<2x256xi1>
    %18 = vector.broadcast %17 : vector<2x256xi1> to vector<2x256xi1>
    %19 = arith.xori %15, %18 : vector<2x256xi1>
    %20 = arith.andi %19, %13 : vector<2x256xi1>
    %21 = vector.broadcast %9 : i32 to vector<2x256xi32>
    %22 = arith.addi %11, %21 : vector<2x256xi32>
    %23 = arith.select %20, %22, %11 : vector<2x256xi1>, vector<2x256xi32>
    %24 = vector.extract_strided_slice %6 {offsets = [0, 255], sizes = [2, 1], strides = [1, 1]} : vector<2x256xf32> to vector<2x1xf32>
    %25 = vector.extract_strided_slice %6 {offsets = [0, 0], sizes = [2, 255], strides = [1, 1]} : vector<2x256xf32> to vector<2x255xf32>
    %26 = tpu.concatenate %24, %25 in 1 : vector<2x1xf32>, vector<2x255xf32> -> vector<2x256xf32>
    %c-1_i32 = arith.constant -1 : i32
    %27 = vector.broadcast %c-1_i32 : i32 to vector<2x256xi32>
    %28 = arith.addi %23, %27 : vector<2x256xi32>
    %c0_i32_7 = arith.constant 0 : i32
    %29 = vector.broadcast %c0_i32_7 : i32 to vector<2x256xi32>
    %30 = arith.cmpi sge, %28, %29 : vector<2x256xi32>
    %c16_i32_8 = arith.constant 16 : i32
    %31 = vector.broadcast %c16_i32_8 : i32 to vector<2x256xi32>
    %32 = arith.cmpi slt, %28, %31 : vector<2x256xi32>
    %33 = arith.andi %30, %32 : vector<2x256xi1>
    %cst_9 = arith.constant 0.000000e+00 : f32
    %34 = vector.broadcast %cst_9 : f32 to vector<2x256xf32>
    %35 = arith.select %33, %26, %34 : vector<2x256xi1>, vector<2x256xf32>
    %36 = arith.maximumf %6, %35 : vector<2x256xf32>
    %37 = vector.extract_strided_slice %6 {offsets = [0, 1], sizes = [2, 255], strides = [1, 1]} : vector<2x256xf32> to vector<2x255xf32>
    %38 = vector.extract_strided_slice %6 {offsets = [0, 0], sizes = [2, 1], strides = [1, 1]} : vector<2x256xf32> to vector<2x1xf32>
    %39 = tpu.concatenate %37, %38 in 1 : vector<2x255xf32>, vector<2x1xf32> -> vector<2x256xf32>
    %c1_i32_10 = arith.constant 1 : i32
    %40 = vector.broadcast %c1_i32_10 : i32 to vector<2x256xi32>
    %41 = arith.addi %23, %40 : vector<2x256xi32>
    %c0_i32_11 = arith.constant 0 : i32
    %42 = vector.broadcast %c0_i32_11 : i32 to vector<2x256xi32>
    %43 = arith.cmpi sge, %41, %42 : vector<2x256xi32>
    %c16_i32_12 = arith.constant 16 : i32
    %44 = vector.broadcast %c16_i32_12 : i32 to vector<2x256xi32>
    %45 = arith.cmpi slt, %41, %44 : vector<2x256xi32>
    %46 = arith.andi %43, %45 : vector<2x256xi1>
    %cst_13 = arith.constant 0.000000e+00 : f32
    %47 = vector.broadcast %cst_13 : f32 to vector<2x256xf32>
    %48 = arith.select %46, %39, %47 : vector<2x256xi1>, vector<2x256xf32>
    %49 = arith.maximumf %36, %48 : vector<2x256xf32>
    %50 = vector.extract_strided_slice %49 {offsets = [0, 240], sizes = [2, 16], strides = [1, 1]} : vector<2x256xf32> to vector<2x16xf32>
    %51 = vector.extract_strided_slice %49 {offsets = [0, 0], sizes = [2, 240], strides = [1, 1]} : vector<2x256xf32> to vector<2x240xf32>
    %52 = tpu.concatenate %50, %51 in 1 : vector<2x16xf32>, vector<2x240xf32> -> vector<2x256xf32>
    %c-16_i32 = arith.constant -16 : i32
    %53 = vector.broadcast %c-16_i32 : i32 to vector<2x256xi32>
    %54 = arith.addi %7, %53 : vector<2x256xi32>
    %c0_i32_14 = arith.constant 0 : i32
    %55 = vector.broadcast %c0_i32_14 : i32 to vector<2x256xi32>
    %56 = arith.cmpi sge, %54, %55 : vector<2x256xi32>
    %c256_i32 = arith.constant 256 : i32
    %57 = vector.broadcast %c256_i32 : i32 to vector<2x256xi32>
    %58 = arith.cmpi slt, %54, %57 : vector<2x256xi32>
    %59 = arith.andi %56, %58 : vector<2x256xi1>
    %cst_15 = arith.constant 0.000000e+00 : f32
    %60 = vector.broadcast %cst_15 : f32 to vector<2x256xf32>
    %61 = arith.select %59, %52, %60 : vector<2x256xi1>, vector<2x256xf32>
    %62 = arith.maximumf %49, %61 : vector<2x256xf32>
    %63 = vector.extract_strided_slice %49 {offsets = [0, 16], sizes = [2, 240], strides = [1, 1]} : vector<2x256xf32> to vector<2x240xf32>
    %64 = vector.extract_strided_slice %49 {offsets = [0, 0], sizes = [2, 16], strides = [1, 1]} : vector<2x256xf32> to vector<2x16xf32>
    %65 = tpu.concatenate %63, %64 in 1 : vector<2x240xf32>, vector<2x16xf32> -> vector<2x256xf32>
    %c16_i32_16 = arith.constant 16 : i32
    %66 = vector.broadcast %c16_i32_16 : i32 to vector<2x256xi32>
    %67 = arith.addi %7, %66 : vector<2x256xi32>
    %c0_i32_17 = arith.constant 0 : i32
    %68 = vector.broadcast %c0_i32_17 : i32 to vector<2x256xi32>
    %69 = arith.cmpi sge, %67, %68 : vector<2x256xi32>
    %c256_i32_18 = arith.constant 256 : i32
    %70 = vector.broadcast %c256_i32_18 : i32 to vector<2x256xi32>
    %71 = arith.cmpi slt, %67, %70 : vector<2x256xi32>
    %72 = arith.andi %69, %71 : vector<2x256xi1>
    %cst_19 = arith.constant 0.000000e+00 : f32
    %73 = vector.broadcast %cst_19 : f32 to vector<2x256xf32>
    %74 = arith.select %72, %65, %73 : vector<2x256xi1>, vector<2x256xf32>
    %75 = arith.maximumf %62, %74 : vector<2x256xf32>
    %cst_20 = arith.constant 1.000000e+00 : f32
    %76 = vector.broadcast %cst_20 : f32 to vector<2x256xf32>
    %77 = arith.subf %76, %75 : vector<2x256xf32>
    %78 = vector.shape_cast %77 : vector<2x256xf32> to vector<1x2x256xf32>
    %cst_21 = arith.constant dense<0.000000e+00> : vector<1xf32>
    %79 = vector.multi_reduction <add>, %78, %cst_21 [1, 2] : vector<1x2x256xf32> to vector<1xf32>
    %80 = vector.shape_cast %79 : vector<1xf32> to vector<1x1x1xf32>
    %81 = vector.extract %80[0, 0, 0] : f32 from vector<1x1x1xf32>
    %cst_22 = arith.constant 1.000000e+00 : f32
    %82 = arith.maximumf %81, %cst_22 : f32
    %cst_23 = arith.constant 5.120000e+02 : f32
    %83 = arith.divf %cst_23, %82 : f32
    %84 = vector.broadcast %83 : f32 to vector<2x256xf32>
    %85 = arith.mulf %77, %84 : vector<2x256xf32>
    %c0_24 = arith.constant 0 : index
    %c0_25 = arith.constant 0 : index
    %86 = vector.load %arg2[%c0_24, %c0_25] : memref<2x256xf32, #tpu.memory_space<vmem>>, vector<2x256xf32>
    tpu.vector_store %arg2[%c0_24, %c0_25], %85 {strides = array<i32>} : memref<2x256xf32, #tpu.memory_space<vmem>>, vector<2x256xf32>,
    return
  }
}

</mosaic_0001>

<bundles_post_ra>
// kernel: _dropblock_forward.3
= control target key start
LH: loop header
LB: loop body
LE: loop exit
PB: predicated region body
PF: predicated region fallthrough
CT: control target
= control target key end

     0   :  { %v23_v0 = vlaneseq  ;;  %s82_s0 = inlined_call_operand.vmem [shape: f32[2,256], index: 0, kind: input, shape index: {}]   ;;  %s83_s1 = inlined_call_operand.vmem [shape: f32[2,4,256], index: 1, kind: input, shape index: {}]   ;;  %s84_s2 = inlined_call_operand.vmem [shape: f32[2,4,256], index: 2, kind: output, shape index: {}]  }
   0x1   :  { %v51_v1 = vld.sshfl [vmem:[%s82_s0] sm:$0x33 pattern:$0x75316420]  ;;  %v13_v11 = vld [vmem:[%s83_s1 + $0x8] sm:$0xff] }
   0x2   :  { %v24_v2 = vshrl.u32 %v23_v0, 7  ;;  %v22_v3 = vcombine.high %v51_v1, %v51_v1  ;;  %v12_v10 = vld [vmem:[%s83_s1] sm:$0xff] }
   0x4   :  { %v25_v4 = vsub.s32 0, %v24_v2  ;;  %v29_v5 = vsub.s32 1, %v24_v2 }
   0x6   :  { %v26_v6 = vrot.slane %v51_v1, %v25_v4  ;;  %v30_v7 = vrot.slane %v51_v1, %v29_v5  ;;  %v34_v8 = vrot.slane %v22_v3, %v25_v4  ;;  %v38_v9 = vrot.slane %v22_v3, %v29_v5 }
   0x8   :  { %v39_v12 = vcombine.low %v26_v6, %v30_v7  ;;  %v40_v13 = vcombine.low %v34_v8, %v38_v9 }
   0xa   :  { %v43_v14 = vmul.f32 %v39_v12, %v12_v10  ;;  %v44_v15 = vmul.f32 %v40_v13, %v13_v11 }
   0xc   :  { %45 = vst [vmem:[%s84_s2] sm:$0xff] %v43_v14  ;;  %46 = vst [vmem:[%s84_s2 + $0x8] sm:$0xff] %v44_v15 }

// kernel: _dropblock_forward.2
= control target key start
LH: loop header
LB: loop body
LE: loop exit
PB: predicated region body
PF: predicated region fallthrough
CT: control target
= control target key end

     0   :  { %8 = vsyncpa [#allocation4], 0  ;;  %s276_s9 = smov [#allocation3]   ;;  %s317_s0 = inlined_call_operand.<no memory space> [shape: f32[1,1], index: 0, kind: input, shape index: {}]   ;;  %s318_s1 = inlined_call_operand.hbm [shape: f32[2,256], index: 1, kind: input, shape index: {}]   ;;  %s319_s2 = inlined_call_operand.vmem [shape: f32[2,256], index: 2, kind: output, shape index: {}]  }
   0x1   :  { %s17_s10 = sshll.u32 %s276_s9, 4  ;;  %s18_s10 = int_to_ptr.vmem [resolvable:$true] %s17_s10 }
   0x2   :  { %s262_s11 = scalar_lea.vmem %s18_s10, 64  ;;  %p267_p1 = scmp.lt.s32.totalorder %s18_s10, %s18_s10 }
   0x3   :  { %p263_p0 = scmp.ne.s32.totalorder %s18_s10, %s262_s11  ;;  %p268_p2 = scmp.lt.s32.totalorder %s262_s11, %s262_s11 }
   0x5   :  { %p269_p3 = por %p268_p2, %p267_p1 }
   0x7   :  { %p270_p4 = pnand %p269_p3, %p263_p0 }
   0x9   :  { %273 = shalt.err (!%p270_p4)
}
   0xa   :  { %20 = dma.hbm_to_vmem [thread:$0]  %s318_s1, 64, %s18_s10, [#allocation4]  }
   0xb   :  { %274 = dma.done.wait [#allocation4], 64  }
   0xc   :  { %275 = vsyncadd [#allocation4], 4294967232  ;;  %v29_v0 = vlaneseq  ;;  %v277_v1 = vmov 1983009808   ;;  %v26_v5 = vstv %s317_s0  ;;  %v25_v7 = vld [vmem:[#allocation3] sm:$0xf] }
   0xd   :  { %v58_v2 = vunpack.c.l.s4 %v277_v1  ;;  %vm27_vm0 = vcmp.lt.f32.partialorder %v25_v7, %v26_v5  ;;  %v278_v8 = vmov 0.0   ;;  %s279_s1 = smov 127   ;;  %s280_s16 = smov 1   ;;  %vm101_vm1 = vcmask 1039360  }
   0xe   :  { %v61_v3 = vshrl.u32 %v29_v0, 7  ;;  %v28_v9 = vsel %vm27_vm0, 1.0, %v278_v8  ;;  %v30_v12 = vand.u32 127, %v29_v0  ;;  %vm70_vm4 = vcmask 7168   ;;  %s281_s0 = smov 16   ;;  %s282_s17 = smov 112  }
   0xf   :  { %v59_v4 = vunpack.c.0.s8 %v58_v2  ;;  %vm143_vm7 = vcmask 130048   ;;  %vm174_vm9 = vcmask 916480   ;;  %vm214_vm11 = vcmask 1041408   ;;  %s283_s19 = smov 1.0  }
  0x10   :  { %v31_v13 = vadd.s32 128, %v30_v12  ;;  %v36_v14 = vand.u32 15, %v30_v12  ;;  %v148_v40 = vadd.s32 4294967280, %v30_v12 }
  0x11   :  { %v305_v6 = vsub.s32 %v59_v4, %v61_v3 }
  0x12   :  { %v43_v15 = vand.u32 15, %v31_v13  ;;  %v107_v16 = vadd.s32 1, %v36_v14  ;;  %v75_v19 = vadd.s32 4294967295, %v36_v14  ;;  %vm150_vm8 = vcmp.ge.s32.totalorder %v148_v40, 0 }
  0x13   :  { %v63_v10 = vrot.slane %v28_v9, %v305_v6  ;;  %v181_v42 = vadd.s32 16, %v31_v13 }
  0x14   :  { %v108_v17 = vadd.s32 1, %v43_v15  ;;  %v76_v20 = vadd.s32 4294967295, %v43_v15  ;;  %vm111_vm2 = vcmp.lt.s32.totalorder %v107_v16, 16  ;;  %vm77_vm5 = vcmp.ge.s32.totalorder %v75_v19, 0 }
  0x15   :  { %97 = vrot.lane.b32.xlu1 %v63_v10, %s279_s1  ;;  %v64_v11 = vcombine.high %v63_v10, %v63_v10  ;;  %vm185_vm10 = vcmp.lt.s32.totalorder %v181_v42, 256 }
  0x16   :  { %vm112_vm3 = vcmp.lt.s32.totalorder %v108_v17, 16  ;;  %vm78_vm6 = vcmp.ge.s32.totalorder %v76_v20, 0 }
  0x17   :  { %65 = vrot.lane.b32.xlu0 %v64_v11, %s280_s16 }
  0x19   :  { %99 = vrot.lane.b32.xlu1 %v64_v11, %s279_s1 }
  0x1b   :  { %68 = vrot.lane.b32.xlu0 %v63_v10, %s280_s16 }
  0x87   :  { %v98_v18 = vpop.permute.xlu1 %97 }
  0x89   :  { %v66_v21 = vpop.permute.xlu0 %65 }
  0x8b   :  { %v100_v22 = vpop.permute.xlu1 %99 }
  0x8c   :  { %v102_v23 = vsel %vm101_vm1, %v98_v18, %v100_v22  ;;  %v106_v24 = vsel %vm101_vm1, %v100_v22, %v98_v18 }
  0x8d   :  { %v115_v25 = vsel %vm111_vm2, %v102_v23, 0.0  ;;  %v116_v26 = vsel %vm112_vm3, %v106_v24, 0.0  ;;  %v69_v27 = vpop.permute.xlu0 %68 }
  0x8e   :  { %v71_v28 = vsel %vm70_vm4, %v69_v27, %v66_v21  ;;  %v74_v29 = vsel %vm70_vm4, %v66_v21, %v69_v27  ;;  %v119_v32 = vcombine.low %v115_v25, %v116_v26 }
  0x8f   :  { %v83_v30 = vsel %vm77_vm5, %v74_v29, 0.0  ;;  %v84_v31 = vsel %vm78_vm6, %v71_v28, 0.0 }
  0x90   :  { %v87_v33 = vcombine.low %v83_v30, %v84_v31  ;;  %v126_v35 = vrot.slane %v119_v32, %v305_v6 }
  0x92   :  { %v94_v34 = vrot.slane %v87_v33, %v305_v6 }
  0x94   :  { %v96_v36 = vmax.f32 %v28_v9, %v94_v34 }
  0x96   :  { %v128_v37 = vmax.f32 %v96_v36, %v126_v35 }
  0x98   :  { %v136_v38 = vrot.slane %v128_v37, %v305_v6 }
  0x9a   :  { %141 = vrot.lane.b32.xlu1 %v136_v38, %s281_s0  ;;  %v137_v39 = vcombine.high %v136_v38, %v136_v38 }
  0x9c   :  { %138 = vrot.lane.b32.xlu0 %v137_v39, %s281_s0 }
  0x9e   :  { %172 = vrot.lane.b32.xlu1 %v137_v39, %s282_s17 }
  0xa0   :  { %170 = vrot.lane.b32.xlu0 %v136_v38, %s282_s17 }
 0x10c   :  { %v142_v41 = vpop.permute.xlu1 %141 }
 0x10e   :  { %v139_v43 = vpop.permute.xlu0 %138 }
 0x10f   :  { %v144_v44 = vsel %vm143_vm7, %v142_v41, %v139_v43  ;;  %v147_v45 = vsel %vm143_vm7, %v139_v43, %v142_v41 }
 0x110   :  { %v156_v46 = vsel %vm150_vm8, %v147_v45, 0.0  ;;  %v173_v48 = vpop.permute.xlu1 %172 }
 0x111   :  { %v160_v47 = vcombine.low %v156_v46, %v144_v44 }
 0x112   :  { %v171_v49 = vpop.permute.xlu0 %170 }
 0x113   :  { %v167_v50 = vrot.slane %v160_v47, %v305_v6  ;;  %v175_v51 = vsel %vm174_vm9, %v171_v49, %v173_v48  ;;  %v179_v52 = vsel %vm174_vm9, %v173_v48, %v171_v49 }
 0x114   :  { %v189_v53 = vsel %vm185_vm10, %v179_v52, 0.0 }
 0x115   :  { %v192_v54 = vcombine.low %v175_v51, %v189_v53  ;;  %v169_v55 = vmax.f32 %v128_v37, %v167_v50 }
 0x117   :  { %v199_v56 = vrot.slane %v192_v54, %v305_v6 }
 0x119   :  { %v201_v57 = vmax.f32 %v169_v55, %v199_v56 }
 0x11b   :  { %v202_v58 = vsub.f32 1.0, %v201_v57 }
 0x11d   :  { %v210_v59 = vrot.slane %v202_v58, %v305_v6 }
 0x11f   :  { %v211_v60 = vcombine.high %v210_v59, %v210_v59  ;;  %v215_v61 = vsel %vm214_vm11, %v210_v59, 0.0 }
 0x121   :  { %v216_v62 = vsel %vm214_vm11, %v211_v60, 0.0 }
 0x122   :  { %v217_v63 = vadd.f32 %v216_v62, %v215_v61 }
 0x124   :  { %218 = vadd.xlane.f32.xlu0 %v217_v63 }
 0x1ad   :  { %v219_v0 = vpop.xlane.xlu0 %218 }
 0x1ae   :  { %v220_v1 = vrot.slane %v219_v0, 4 }
 0x1b0   :  { %v221_v2 = vadd.f32 %v220_v1, %v219_v0 }
 0x1b2   :  { %v222_v3 = vrot.slane %v221_v2, 2 }
 0x1b4   :  { %v223_v4 = vadd.f32 %v222_v3, %v221_v2 }
 0x1b6   :  { %v224_v5 = vrot.slane %v223_v4, 1 }
 0x1b8   :  { %v225_v7 = vadd.f32 %v224_v5, %v223_v4 }
 0x1ba   :  { %240 = vpush %v225_v7 }
 0x1eb   :  { %s241_s18 = spop %240 }
 0x1ec   :  { %s227_s20 = smax.f32 %s283_s19, %s241_s18 }
 0x1ed   :  { %v228_v8 = vstv %s227_s20 }
 0x1ee   :  { %252 = vrcp.f32 %v228_v8 }
 0x1fb   :  { %v253_v6 = vpop.eup %252 }
 0x1fc   :  { %242 = vpush %v253_v6 }
 0x22d   :  { %s243_s21 = spop %242 }
 0x22e   :  { %s231_s22 = smul.f32 512.0, %s243_s21 }
 0x230   :  { %v232_v9 = vstv %s231_s22 }
 0x231   :  { %v233_v10 = vmul.f32 %v232_v9, %v202_v58 }
 0x233   :  { %234 = vst [vmem:[%s319_s2] sm:$0xf] %v233_v10 }
 0x234   :  { %239 = vsyncpa [#allocation4], 1 }

</bundles_post_ra>
